<compile_context>
chip_gen: v7x
topology: tpu7x:2x2x1
jax: 0.10.0
libtpu: 0.0.40
codegen_flags: <defaults>
</compile_context>

<pallas_src>
import jax
import jax.numpy as jnp
from jax.experimental import pallas as pl
from jax.experimental.pallas import tpu as pltpu


_TARGET_STEP_BYTES = 8 << 20  # >= 8 MiB moved per branch per grid step (covers v7x HBM)


def _vmem_capacity_bytes():
    try:
        return int(pltpu.get_tpu_info().vmem_capacity_bytes)
    except Exception:
        return 64 * 1024 * 1024  # conservative fallback (v7x per-TensorCore VMEM)


def _plan_tiling(B, C, hw, dtype_bytes, P, hidden, force=None):
    """Pick (tb, t_hw, num_t, hw_eff).

    tb    : batch rows per block
    t_hw  : spatial lanes per block
    num_t : number of spatial reduction steps (grid axis 1); 1 == fast path
    hw_eff: spatial extent after (optional) zero padding to a tile multiple
    """
    if force is not None:  # test-only override; t_hw must be a multiple of 128 (or >= hw)
        tb, t_hw = force
        if t_hw >= hw:
            return tb, hw, 1, hw
        hw_eff = -(-hw // t_hw) * t_hw
        return tb, t_hw, hw_eff // t_hw, hw_eff

    cap = _vmem_capacity_bytes()
    w_bytes = 2 * 4 * (C * hidden + hidden + hidden * C + C)  # double-buffered weights (f32)
    budget = cap // 2 - w_bytes - (1 << 20)                   # headroom for out/acc/spills
    budget = max(budget, P * 2 * C * 128 * dtype_bytes)       # always allow a 128-lane tile
    target = _TARGET_STEP_BYTES

    def x_fp(tb, t_hw):  # double-buffered input-pipeline footprint
        return P * 2 * tb * C * t_hw * dtype_bytes

    if x_fp(1, hw) <= budget:
        # Fast path: whole spatial extent in one block; pack batch rows until
        # the per-step byte target is met or the VMEM budget is hit.
        tb = 1
        for d in range(1, B + 1):
            if B % d:
                continue
            if x_fp(d, hw) > budget:
                break
            tb = d
            if d * C * hw * dtype_bytes >= target:
                break
        return tb, hw, 1, hw

    # Spatial tiling: largest lane-aligned (multiple-of-128) divisor of hw
    # under the VMEM budget, stopping once the per-step byte target is met.
    hw_eff = -(-hw // 128) * 128
    # TODO(synk): when hw is not a multiple of 128 the wrapper zero-pads the
    # (huge-map) input — one extra HBM copy; a masked tail tile would avoid it.
    cands = [k * 128 for k in range(1, hw_eff // 128 + 1) if hw_eff % (k * 128) == 0]
    fitting = [c for c in cands if x_fp(1, c) <= budget] or [128]
    reaching = [c for c in fitting if c * C * dtype_bytes >= target]
    t_hw = min(reaching) if reaching else max(fitting)
    return 1, t_hw, hw_eff // t_hw, hw_eff


def _make_kernel(P, tb, C, inv_hw, multi_step):
    def kernel(*refs):
        x_refs = refs[:P]                              # each (tb, C, t_hw)
        w1_ref, b1_ref, w2_ref, b2_ref = refs[P:P + 4]
        g_ref = refs[P + 4]                            # (tb, P*C) lane-dense gate

        def mlp_and_store(avg):                        # avg: (P*tb, C) f32
            # gate_c_fc_0 (+ folded gate_c_bn_1) -> gate_c_relu_1 -> gate_c_fc_final
            h = jnp.dot(avg, w1_ref[...], preferred_element_type=jnp.float32)
            h = jnp.maximum(h + b1_ref[...], 0.0)
            g = jnp.dot(h, w2_ref[...], preferred_element_type=jnp.float32)
            g = g + b2_ref[...]                        # (P*tb, C)
            rows = [g[p * tb:(p + 1) * tb, :] for p in range(P)]
            g_ref[...] = jnp.concatenate(rows, axis=-1).astype(g_ref.dtype)

        # Per-step lane reduce.  (On v7x a lane-partial accumulator could defer
        # the XLU reduce to finalize, but the loop stays DMA-bound at these
        # tile sizes.)
        parts = [jnp.sum(x_refs[p][...].astype(jnp.float32), axis=-1)
                 for p in range(P)]                    # each (tb, C)
        partial = jnp.concatenate(parts, axis=0)       # (P*tb, C)

        if multi_step:
            acc_ref = refs[P + 5]                      # (P*tb, C) f32 scratch
            t = pl.program_id(1)

            @pl.when(t == 0)
            def _init():
                acc_ref[...] = jnp.zeros_like(acc_ref)

            acc_ref[...] += partial                    # single full-tile update

            @pl.when(t == pl.num_programs(1) - 1)
            def _fin():
                mlp_and_store(acc_ref[...] * inv_hw)
        else:
            mlp_and_store(partial * inv_hw)

    return kernel


def channel_gate(xs, params, *, force_tiles=None):
    """xs: list of num_parallel arrays, each (B, C, H, W). Returns list of same shapes."""
    P = len(xs)
    B, C, H, W = xs[0].shape
    # TODO(synk): F.avg_pool2d(x, H, stride=H) on rectangular (W != H) inputs keeps a
    # (1, W//H) spatial extent before Flatten; this kernel implements the square case.
    assert H == W, "ChannelGate kernel assumes square feature maps (H == W)."
    HW = H * W
    dtype = xs[0].dtype
    dtype_bytes = jnp.dtype(dtype).itemsize

    w1t, b1, gamma, beta, rmean, rvar, w2t, b2 = params
    hidden = w1t.shape[1]

    # Fold inference-mode BatchNorm1d into the first Linear (trace time, tiny).
    eps = 1e-5
    s = gamma * jax.lax.rsqrt(rvar + eps)                  # (1, hidden)
    w1t_f = (w1t * s).astype(jnp.float32)                  # (C, hidden)
    b1_f = ((b1 - rmean) * s + beta).astype(jnp.float32)   # (1, hidden)

    tb, t_hw, T, hw_eff = _plan_tiling(B, C, HW, dtype_bytes, P, hidden, force=force_tiles)

    # Free reshape (contiguous merge of last two dims): reduction runs over lanes.
    branches = [x.reshape(B, C, HW) for x in xs]
    if hw_eff != HW:
        branches = [jnp.pad(x, ((0, 0), (0, 0), (0, hw_eff - HW))) for x in branches]

    kernel = _make_kernel(P, tb, C, 1.0 / float(HW), T > 1)

    if T > 1:
        x_map = lambda b, t: (b, 0, t)
        c_map = lambda b, t: (0, 0)
        o_map = lambda b, t: (b, 0)
        grid = (B // tb, T)
        dims = ("parallel", "arbitrary")
        scratch = [pltpu.VMEM((P * tb, C), jnp.float32)]
    else:
        x_map = lambda b: (b, 0, 0)
        c_map = lambda b: (0, 0)
        o_map = lambda b: (b, 0)
        grid = (B // tb,)
        dims = ("parallel",)
        scratch = []
    # TODO(synk): when B // tb < 2 on a 2-TensorCore chip (v7x) the spatial
    # reduction could additionally be split over a leading parallel axis (two
    # partial accumulators combined in finalize) to keep both cores busy.

    in_specs = (
        [pl.BlockSpec((tb, C, t_hw), x_map) for _ in range(P)]
        + [
            pl.BlockSpec((C, hidden), c_map),    # W1^T (BN folded in)
            pl.BlockSpec((1, hidden), c_map),    # b1   (BN folded in)
            pl.BlockSpec((hidden, C), c_map),    # W2^T
            pl.BlockSpec((1, C), c_map),         # b2
        ]
    )

    # Explicit VMEM budget (scoped default is 16/32 MiB of 128/64 MiB physical).
    cap = _vmem_capacity_bytes()
    x_fp = P * 2 * tb * C * t_hw * dtype_bytes
    w_fp = 2 * 4 * (C * hidden + hidden + hidden * C + C)
    o_fp = 2 * tb * P * C * dtype_bytes + 4 * P * tb * C
    vmem_limit = int(max(32 << 20, min(cap - (8 << 20), x_fp + w_fp + o_fp + (16 << 20))))

    flops = int(P * B * (C * HW + 2 * C * hidden + 2 * hidden * C))
    bytes_accessed = int(P * B * C * HW * dtype_bytes
                         + 4 * (C * hidden + hidden + hidden * C + C)
                         + B * P * C * dtype_bytes)

    gates = pl.pallas_call(
        kernel,
        out_shape=jax.ShapeDtypeStruct((B, P * C), dtype),
        grid_spec=pltpu.PrefetchScalarGridSpec(
            num_scalar_prefetch=0,
            grid=grid,
            in_specs=in_specs,
            out_specs=pl.BlockSpec((tb, P * C), o_map),
            scratch_shapes=scratch,
        ),
        compiler_params=pltpu.CompilerParams(
            dimension_semantics=dims,
            vmem_limit_bytes=vmem_limit),
        cost_estimate=pl.CostEstimate(
            flops=flops, transcendentals=0, bytes_accessed=bytes_accessed),
    )(*branches, w1t_f, b1_f, w2t.astype(jnp.float32), b2.astype(jnp.float32))

    gates = gates.reshape(B, P, C)
    # .unsqueeze(2).unsqueeze(3).expand_as(in_tensor): lazy broadcast in the
    # wrapper — the kernel only ever writes the (B, P*C) gate to HBM.
    return [jnp.broadcast_to(gates[:, p, :][:, :, None, None], (B, C, H, W))
            for p in range(P)]


def make_params(key, gate_channel, reduction_ratio=16):
    C = gate_channel
    Hd = max(C // reduction_ratio, 1)
    ks = jax.random.split(key, 6)
    # Linear weights stored pre-transposed: y = x @ W^T + b  ->  pass W^T.
    w1t = jax.random.normal(ks[0], (C, Hd), jnp.float32) * 0.1
    b1 = jax.random.normal(ks[1], (1, Hd), jnp.float32) * 0.1
    gamma = 1.0 + 0.1 * jax.random.normal(ks[2], (1, Hd), jnp.float32)
    beta = 0.1 * jax.random.normal(ks[3], (1, Hd), jnp.float32)
    rmean = 0.05 * jax.random.normal(ks[4], (1, Hd), jnp.float32)
    rvar = jnp.ones((1, Hd), jnp.float32) * 1.2
    w2t = jax.random.normal(ks[5], (Hd, C), jnp.float32) * 0.1
    b2 = jnp.zeros((1, C), jnp.float32)
    return (w1t, b1, gamma, beta, rmean, rvar, w2t, b2)


def channel_gate_ref(xs, params):
    """Pure-JAX reference mirroring the PyTorch module (inference-mode BN)."""
    w1t, b1, gamma, beta, rmean, rvar, w2t, b2 = params
    outs = []
    for x in xs:
        B, C, H, W = x.shape
        avg = jnp.mean(x.reshape(B, C, H * W), axis=-1)
        h = avg @ w1t + b1
        h = (h - rmean) * gamma / jnp.sqrt(rvar + 1e-5) + beta
        h = jnp.maximum(h, 0.0)
        g = h @ w2t + b2
        outs.append(jnp.broadcast_to(g[:, :, None, None], (B, C, H, W)))
    return outs


if __name__ == "__main__":
    key = jax.random.PRNGKey(0)
    kx0, kx1, kp = jax.random.split(key, 3)

    # gate_channel=64, reduction_ratio=16 -> hidden=4; num_parallel=2
    B, C, H, W = 2, 64, 16, 16
    xs = [jax.random.normal(kx0, (B, C, H, W), jnp.float32),
          jax.random.normal(kx1, (B, C, H, W), jnp.float32)]
    params = make_params(kp, gate_channel=C, reduction_ratio=16)
    refs = channel_gate_ref(xs, params)

    # 1) Auto-planned path: small map -> single-step fast path, batch packed.
    outs = [jax.block_until_ready(o) for o in channel_gate(xs, params)]
    for o, r in zip(outs, refs):
        assert o.shape == r.shape, (o.shape, r.shape)
        err = float(jnp.max(jnp.abs(o - r)))
        assert jnp.allclose(o, r, rtol=1e-3, atol=1e-3), err

    # 2) Forced spatial tiling: exercises the multi-step accumulator path.
    outs = [jax.block_until_ready(o)
            for o in channel_gate(xs, params, force_tiles=(1, 128))]
    for o, r in zip(outs, refs):
        err = float(jnp.max(jnp.abs(o - r)))
        assert jnp.allclose(o, r, rtol=1e-3, atol=1e-3), err

    print("KERNEL_OK")
</pallas_src>

<mosaic_0001>
module attributes {stable_mosaic.version = 11 : i64} {
  func.func @kernel(%arg0: i32, %arg1: memref<2x64x256xf32, #tpu.memory_space<vmem>>, %arg2: memref<2x64x256xf32, #tpu.memory_space<vmem>>, %arg3: memref<64x4xf32, #tpu.memory_space<vmem>>, %arg4: memref<1x4xf32, #tpu.memory_space<vmem>>, %arg5: memref<4x64xf32, #tpu.memory_space<vmem>>, %arg6: memref<1x64xf32, #tpu.memory_space<vmem>>, %arg7: memref<2x128xf32, #tpu.memory_space<vmem>>) attributes {dimension_semantics = [#tpu.dimension_semantics<parallel>], iteration_bounds = array<i64: 1>, scalar_prefetch = 0 : i64, scratch_operands = 0 : i64, tpu.core_type = #tpu.core_type<tc>, window_params = [{transform_indices = @transform_0, window_bounds = array<i64: 2, 64, 256>}, {transform_indices = @transform_1, window_bounds = array<i64: 2, 64, 256>}, {pipeline_mode = #tpu.pipeline_mode<synchronous>, transform_indices = @transform_2, window_bounds = array<i64: 64, 4>}, {pipeline_mode = #tpu.pipeline_mode<synchronous>, transform_indices = @transform_3, window_bounds = array<i64: 1, 4>}, {pipeline_mode = #tpu.pipeline_mode<synchronous>, transform_indices = @transform_4, window_bounds = array<i64: 4, 64>}, {pipeline_mode = #tpu.pipeline_mode<synchronous>, transform_indices = @transform_5, window_bounds = array<i64: 1, 64>}, {transform_indices = @transform_6, window_bounds = array<i64: 2, 128>}]} {
    %c0 = arith.constant 0 : index
    %c0_0 = arith.constant 0 : index
    %c0_1 = arith.constant 0 : index
    %0 = vector.load %arg1[%c0, %c0_0, %c0_1] : memref<2x64x256xf32, #tpu.memory_space<vmem>>, vector<2x64x256xf32>
    %cst = arith.constant dense<0.000000e+00> : vector<2x64xf32>
    %1 = vector.multi_reduction <add>, %0, %cst [2] : vector<2x64x256xf32> to vector<2x64xf32>
    %c0_2 = arith.constant 0 : index
    %c0_3 = arith.constant 0 : index
    %c0_4 = arith.constant 0 : index
    %2 = vector.load %arg2[%c0_2, %c0_3, %c0_4] : memref<2x64x256xf32, #tpu.memory_space<vmem>>, vector<2x64x256xf32>
    %cst_5 = arith.constant dense<0.000000e+00> : vector<2x64xf32>
    %3 = vector.multi_reduction <add>, %2, %cst_5 [2] : vector<2x64x256xf32> to vector<2x64xf32>
    %4 = tpu.concatenate %1, %3 in 0 : vector<2x64xf32>, vector<2x64xf32> -> vector<4x64xf32>
    %cst_6 = arith.constant 3.906250e-03 : f32
    %5 = vector.broadcast %cst_6 : f32 to vector<4x64xf32>
    %6 = arith.mulf %4, %5 : vector<4x64xf32>
    %c0_7 = arith.constant 0 : index
    %c0_8 = arith.constant 0 : index
    %7 = vector.load %arg3[%c0_7, %c0_8] : memref<64x4xf32, #tpu.memory_space<vmem>>, vector<64x4xf32>
    %cst_9 = arith.constant dense<0.000000e+00> : vector<4x4xf32>
    %8 = tpu.matmul %6, %7, %cst_9 {dimension_numbers = #tpu.dot_dimension_numbers<[1], [0], [0], [1], [0, 0, 1, 1], [], []>} : vector<4x64xf32>, vector<64x4xf32>, vector<4x4xf32> -> vector<4x4xf32>
    %c0_10 = arith.constant 0 : index
    %c0_11 = arith.constant 0 : index
    %9 = vector.load %arg4[%c0_10, %c0_11] : memref<1x4xf32, #tpu.memory_space<vmem>>, vector<1x4xf32>
    %10 = vector.broadcast %9 : vector<1x4xf32> to vector<4x4xf32>
    %11 = arith.addf %8, %10 : vector<4x4xf32>
    %cst_12 = arith.constant 0.000000e+00 : f32
    %12 = vector.broadcast %cst_12 : f32 to vector<4x4xf32>
    %13 = arith.maximumf %11, %12 : vector<4x4xf32>
    %c0_13 = arith.constant 0 : index
    %c0_14 = arith.constant 0 : index
    %14 = vector.load %arg5[%c0_13, %c0_14] : memref<4x64xf32, #tpu.memory_space<vmem>>, vector<4x64xf32>
    %cst_15 = arith.constant dense<0.000000e+00> : vector<4x64xf32>
    %15 = tpu.matmul %13, %14, %cst_15 {dimension_numbers = #tpu.dot_dimension_numbers<[1], [0], [0], [1], [0, 0, 1, 1], [], []>} : vector<4x4xf32>, vector<4x64xf32>, vector<4x64xf32> -> vector<4x64xf32>
    %c0_16 = arith.constant 0 : index
    %c0_17 = arith.constant 0 : index
    %16 = vector.load %arg6[%c0_16, %c0_17] : memref<1x64xf32, #tpu.memory_space<vmem>>, vector<1x64xf32>
    %17 = vector.broadcast %16 : vector<1x64xf32> to vector<4x64xf32>
    %18 = arith.addf %15, %17 : vector<4x64xf32>
    %19 = vector.extract_strided_slice %18 {offsets = [0, 0], sizes = [2, 64], strides = [1, 1]} : vector<4x64xf32> to vector<2x64xf32>
    %20 = vector.extract_strided_slice %18 {offsets = [2, 0], sizes = [2, 64], strides = [1, 1]} : vector<4x64xf32> to vector<2x64xf32>
    %21 = tpu.concatenate %19, %20 in 1 : vector<2x64xf32>, vector<2x64xf32> -> vector<2x128xf32>
    %c0_18 = arith.constant 0 : index
    %c0_19 = arith.constant 0 : index
    %22 = vector.load %arg7[%c0_18, %c0_19] : memref<2x128xf32, #tpu.memory_space<vmem>>, vector<2x128xf32>
    tpu.vector_store %arg7[%c0_18, %c0_19], %21 {strides = array<i32>} : memref<2x128xf32, #tpu.memory_space<vmem>>, vector<2x128xf32>,
    return
  }
  func.func @transform_0(%arg0: i32) -> (i32, i32, i32) {
    %c0_i32 = arith.constant 0 : i32
    %c0_i32_0 = arith.constant 0 : i32
    %c0_i32_1 = arith.constant 0 : i32
    return %arg0, %c0_i32, %c0_i32_0 : i32, i32, i32
  }
  func.func @transform_1(%arg0: i32) -> (i32, i32, i32) {
    %c0_i32 = arith.constant 0 : i32
    %c0_i32_0 = arith.constant 0 : i32
    %c0_i32_1 = arith.constant 0 : i32
    return %arg0, %c0_i32, %c0_i32_0 : i32, i32, i32
  }
  func.func @transform_2(%arg0: i32) -> (i32, i32) {
    %c0_i32 = arith.constant 0 : i32
    %c0_i32_0 = arith.constant 0 : i32
    %c0_i32_1 = arith.constant 0 : i32
    return %c0_i32, %c0_i32_0 : i32, i32
  }
  func.func @transform_3(%arg0: i32) -> (i32, i32) {
    %c0_i32 = arith.constant 0 : i32
    %c0_i32_0 = arith.constant 0 : i32
    %c0_i32_1 = arith.constant 0 : i32
    return %c0_i32, %c0_i32_0 : i32, i32
  }
  func.func @transform_4(%arg0: i32) -> (i32, i32) {
    %c0_i32 = arith.constant 0 : i32
    %c0_i32_0 = arith.constant 0 : i32
    %c0_i32_1 = arith.constant 0 : i32
    return %c0_i32, %c0_i32_0 : i32, i32
  }
  func.func @transform_5(%arg0: i32) -> (i32, i32) {
    %c0_i32 = arith.constant 0 : i32
    %c0_i32_0 = arith.constant 0 : i32
    %c0_i32_1 = arith.constant 0 : i32
    return %c0_i32, %c0_i32_0 : i32, i32
  }
  func.func @transform_6(%arg0: i32) -> (i32, i32) {
    %c0_i32 = arith.constant 0 : i32
    %c0_i32_0 = arith.constant 0 : i32
    return %arg0, %c0_i32 : i32, i32
  }
}

</mosaic_0001>

<bundles_post_ra>
// kernel: tpu_custom_call.1
= control target key start
LH: loop header
LB: loop body
LE: loop exit
PB: predicated region body
PF: predicated region fallthrough
CT: control target
= control target key end

     0   :  { %11 = vsyncpa [#allocation3], 0  ;;  %s986_s0 = inlined_call_operand.hbm [shape: f32[2,64,256], index: 0, kind: input, shape index: {}]   ;;  %s987_s1 = inlined_call_operand.hbm [shape: f32[2,64,256], index: 1, kind: input, shape index: {}]   ;;  %s988_s2 = inlined_call_operand.vmem [shape: f32[64,4], index: 2, kind: input, shape index: {}]   ;;  %s989_s3 = inlined_call_operand.vmem [shape: f32[1,4], index: 3, kind: input, shape index: {}]   ;;  %s990_s4 = inlined_call_operand.vmem [shape: f32[4,64], index: 4, kind: input, shape index: {}]   ;;  %s991_s5 = inlined_call_operand.vmem [shape: f32[1,64], index: 5, kind: input, shape index: {}]   ;;  %s992_s6 = inlined_call_operand.hbm [shape: f32[2,128], index: 6, kind: output, shape index: {}]  }
   0x1   :  { %12 = vsyncpa [#allocation6], 0 }
   0x2   :  { %13 = vsyncpa [#allocation4], 0  ;;  %s757_s21 = smov [#allocation2]   ;;  %s685_s25 = scalar_lea.hbm %s986_s0, 4096 }
   0x3   :  { %s19_s22 = sshll.u32 %s757_s21, 4  ;;  %p686_p0 = scmp.ne.s32.totalorder %s986_s0, %s685_s25  ;;  %s20_s22 = int_to_ptr.vmem [resolvable:$true] %s19_s22 }
   0x4   :  { %p689_p1 = scmp.lt.u32.totalorder %s685_s25, %s986_s0 }
   0x6   :  { %p691_p2 = pnand %p689_p1, %p686_p0 }
   0x8   :  { %694 = shalt.err (!%p691_p2)
}
   0x9   :  { %s695_s30 = scalar_lea.vmem %s20_s22, 4096  ;;  %p700_p4 = scmp.lt.s32.totalorder %s20_s22, %s20_s22 }
   0xa   :  { %p696_p3 = scmp.ne.s32.totalorder %s20_s22, %s695_s30  ;;  %p701_p5 = scmp.lt.s32.totalorder %s695_s30, %s695_s30 }
   0xc   :  { %p702_p6 = por %p701_p5, %p700_p4 }
   0xe   :  { %p703_p7 = pnand %p702_p6, %p696_p3 }
  0x10   :  { %706 = shalt.err (!%p703_p7)
}
  0x11   :  { %s758_s7 = smov 256   ;;  %s759_s8 = smov 16  }
  0x12   :  { %25 = dma.hbm_to_vmem [thread:$0]  %s986_s0, 4096, %s20_s22, [#allocation3], %s758_s7, %s758_s7, %s759_s8  }
  0x13   :  { %s760_s11 = smov [#allocation5]   ;;  %s707_s15 = scalar_lea.hbm %s987_s1, 4096 }
  0x14   :  { %s31_s12 = sshll.u32 %s760_s11, 4  ;;  %p708_p8 = scmp.ne.s32.totalorder %s987_s1, %s707_s15  ;;  %s32_s12 = int_to_ptr.vmem [resolvable:$true] %s31_s12 }
  0x15   :  { %p711_p9 = scmp.lt.u32.totalorder %s707_s15, %s987_s1 }
  0x17   :  { %p713_p10 = pnand %p711_p9, %p708_p8 }
  0x19   :  { %716 = shalt.err (!%p713_p10)
}
  0x1a   :  { %s717_s20 = scalar_lea.vmem %s32_s12, 4096  ;;  %p722_p12 = scmp.lt.s32.totalorder %s32_s12, %s32_s12 }
  0x1b   :  { %p718_p11 = scmp.ne.s32.totalorder %s32_s12, %s717_s20  ;;  %p723_p13 = scmp.lt.s32.totalorder %s717_s20, %s717_s20 }
  0x1d   :  { %p724_p0 = por %p723_p13, %p722_p12 }
  0x1f   :  { %p725_p1 = pnand %p724_p0, %p718_p11 }
  0x21   :  { %728 = shalt.err (!%p725_p1)
}
  0x22   :  { %37 = dma.hbm_to_vmem [thread:$0]  %s987_s1, 4096, %s32_s12, [#allocation6], %s758_s7, %s758_s7, %s759_s8  }
  0x23   :  { %751 = dma.done.wait [#allocation3], 4096  }
  0x24   :  { %752 = vsyncadd [#allocation3], 4294963200 }
  0x25   :  { %753 = dma.done.wait [#allocation6], 4096  }
  0x26   :  { %754 = vsyncadd [#allocation6], 4294963200  ;;  %v68_v0 = vld [vmem:[#allocation2 + $0x80] sm:$0xff]  ;;  %v69_v1 = vld [vmem:[#allocation2 + $0x88] sm:$0xff]  ;;  %vm762_vm0 = vmmov 0   ;;  %vm239_vm1 = vcmask 130112  }
  0x27   :  { %v52_v2 = vld [vmem:[#allocation2] sm:$0xff]  ;;  %v108_v3 = vadd.f32 %v69_v1, %v68_v0  ;;  %v53_v4 = vld [vmem:[#allocation2 + $0x8] sm:$0xff]  ;;  %v70_v5 = vld [vmem:[#allocation2 + $0x90] sm:$0xff]  ;;  %vm246_vm2 = vcmask 195712   ;;  %vm253_vm3 = vcmask 261312   ;;  %vm260_vm4 = vcmask 326912  }
  0x28   :  { %v71_v6 = vld [vmem:[#allocation2 + $0x98] sm:$0xff]  ;;  %v84_v7 = vadd.f32 %v53_v4, %v52_v2  ;;  %v54_v8 = vld [vmem:[#allocation2 + $0x10] sm:$0xff]  ;;  %v132_v14 = vld [vmem:[#allocation5] sm:$0xff]  ;;  %vm267_vm5 = vcmask 392512   ;;  %vm274_vm6 = vcmask 458112   ;;  %vm281_vm7 = vcmask 523712  }
  0x29   :  { %v55_v9 = vld [vmem:[#allocation2 + $0x18] sm:$0xff]  ;;  %109 = vadd.xlane.f32.xlu1 %v108_v3  ;;  %v111_v10 = vadd.f32 %v71_v6, %v70_v5  ;;  %v134_v12 = vld [vmem:[#allocation5 + $0x10] sm:$0xff]  ;;  %v133_v15 = vld [vmem:[#allocation5 + $0x8] sm:$0xff]  ;;  %vm322_vm8 = vcmask 1041409   ;;  %vm419_vm9 = vcmask 1043459   ;;  %vm422_vm10 = vcmask 1041408  }
  0x2a   :  { %85 = vadd.xlane.f32.xlu0 %v84_v7  ;;  %v87_v11 = vadd.f32 %v55_v9, %v54_v8  ;;  %v135_v13 = vld [vmem:[#allocation5 + $0x18] sm:$0xff]  ;;  %v164_v17 = vadd.f32 %v133_v15, %v132_v14  ;;  %v150_v18 = vld [vmem:[#allocation5 + $0x90] sm:$0xff]  ;;  %v148_v20 = vld [vmem:[#allocation5 + $0x80] sm:$0xff]  ;;  %vm440_vm11 = vcmask 523264   ;;  %vm527_vm12 = vcmask 1043456   ;;  %s765_s18 = smov [#allocation7]  }
  0x2b   :  { %v167_v16 = vadd.f32 %v135_v13, %v134_v12  ;;  %v151_v19 = vld [vmem:[#allocation5 + $0x98] sm:$0xff]  ;;  %v149_v21 = vld [vmem:[#allocation5 + $0x88] sm:$0xff]  ;;  %v72_v24 = vld [vmem:[#allocation2 + $0xa0] sm:$0xff]  ;;  %vm523_vm13 = vcmask 31744   ;;  %s614_s19 = sshll.u32 %s765_s18, 4  ;;  %s615_s19 = int_to_ptr.vmem [resolvable:$true] %s614_s19 }
  0x2c   :  { %v191_v22 = vadd.f32 %v151_v19, %v150_v18  ;;  %v188_v23 = vadd.f32 %v149_v21, %v148_v20  ;;  %v73_v25 = vld [vmem:[#allocation2 + $0xa8] sm:$0xff]  ;;  %v56_v26 = vld [vmem:[#allocation2 + $0x20] sm:$0xff]  ;;  %v74_v36 = vld [vmem:[#allocation2 + $0xb0] sm:$0xff]  ;;  %p734_p3 = scmp.lt.s32.totalorder %s615_s19, %s615_s19 }
  0x2d   :  { %112 = vadd.xlane.f32.xlu1 %v111_v10  ;;  %v57_v27 = vld [vmem:[#allocation2 + $0x28] sm:$0xff]  ;;  %v114_v28 = vadd.f32 %v73_v25, %v72_v24  ;;  %v152_v30 = vld [vmem:[#allocation5 + $0xa0] sm:$0xff]  ;;  %v75_v37 = vld [vmem:[#allocation2 + $0xb8] sm:$0xff] }
  0x2e   :  { %88 = vadd.xlane.f32.xlu0 %v87_v11  ;;  %v90_v29 = vadd.f32 %v57_v27, %v56_v26  ;;  %v153_v31 = vld [vmem:[#allocation5 + $0xa8] sm:$0xff]  ;;  %v136_v32 = vld [vmem:[#allocation5 + $0x20] sm:$0xff]  ;;  %v58_v38 = vld [vmem:[#allocation2 + $0x30] sm:$0xff]  ;;  %v117_v40 = vadd.f32 %v75_v37, %v74_v36 }
  0x2f   :  { %v137_v33 = vld [vmem:[#allocation5 + $0x28] sm:$0xff]  ;;  %v194_v34 = vadd.f32 %v153_v31, %v152_v30  ;;  %v59_v39 = vld [vmem:[#allocation2 + $0x38] sm:$0xff]  ;;  %v154_v42 = vld [vmem:[#allocation5 + $0xb0] sm:$0xff] }
  0x30   :  { %v170_v35 = vadd.f32 %v137_v33, %v136_v32  ;;  %v93_v41 = vadd.f32 %v59_v39, %v58_v38  ;;  %v155_v43 = vld [vmem:[#allocation5 + $0xb8] sm:$0xff]  ;;  %v138_v44 = vld [vmem:[#allocation5 + $0x30] sm:$0xff]  ;;  %v76_v48 = vld [vmem:[#allocation2 + $0xc0] sm:$0xff] }
  0x31   :  { %168 = vadd.xlane.f32.xlu1 %v167_v16  ;;  %v139_v45 = vld [vmem:[#allocation5 + $0x38] sm:$0xff]  ;;  %v197_v46 = vadd.f32 %v155_v43, %v154_v42  ;;  %v77_v49 = vld [vmem:[#allocation2 + $0xc8] sm:$0xff]  ;;  %v60_v50 = vld [vmem:[#allocation2 + $0x40] sm:$0xff] }
  0x32   :  { %165 = vadd.xlane.f32.xlu0 %v164_v17  ;;  %v173_v47 = vadd.f32 %v139_v45, %v138_v44  ;;  %v61_v51 = vld [vmem:[#allocation2 + $0x48] sm:$0xff]  ;;  %v120_v52 = vadd.f32 %v77_v49, %v76_v48  ;;  %v156_v54 = vld [vmem:[#allocation5 + $0xc0] sm:$0xff]  ;;  %v78_v60 = vld [vmem:[#allocation2 + $0xd0] sm:$0xff]  ;;  %v763_v45 = vmov 0.0  }
  0x33   :  { %v96_v53 = vadd.f32 %v61_v51, %v60_v50  ;;  %v157_v55 = vld [vmem:[#allocation5 + $0xc8] sm:$0xff]  ;;  %v140_v56 = vld [vmem:[#allocation5 + $0x40] sm:$0xff]  ;;  %v79_v61 = vld [vmem:[#allocation2 + $0xd8] sm:$0xff]  ;;  %656 = vmatprep.mubr.msk.f32.mxu0 %vm762_vm0, %v763_v45  ;;  %659 = vmatprep.subr.mxu1 %v763_v45 }
  0x34   :  { %v141_v57 = vld [vmem:[#allocation5 + $0x48] sm:$0xff]  ;;  %v200_v58 = vadd.f32 %v157_v55, %v156_v54  ;;  %v62_v62 = vld [vmem:[#allocation2 + $0x50] sm:$0xff]  ;;  %v63_v63 = vld [vmem:[#allocation2 + $0x58] sm:$0xff]  ;;  %v123_v0 = vadd.f32 %v79_v61, %v78_v60  ;;  %661 = vmatprep.mubr.msk.f32.mxu1 %vm762_vm0, %v763_v45 }
  0x35   :  { %192 = vadd.xlane.f32.xlu1 %v191_v22  ;;  %v176_v59 = vadd.f32 %v141_v57, %v140_v56  ;;  %v99_v1 = vadd.f32 %v63_v63, %v62_v62  ;;  %v158_v2 = vld [vmem:[#allocation5 + $0xd0] sm:$0xff]  ;;  %v159_v3 = vld [vmem:[#allocation5 + $0xd8] sm:$0xff]  ;;  %v80_v8 = vld [vmem:[#allocation2 + $0xe0] sm:$0xff] }
  0x36   :  { %189 = vadd.xlane.f32.xlu0 %v188_v23  ;;  %v142_v4 = vld [vmem:[#allocation5 + $0x50] sm:$0xff]  ;;  %v143_v5 = vld [vmem:[#allocation5 + $0x58] sm:$0xff]  ;;  %v203_v6 = vadd.f32 %v159_v3, %v158_v2  ;;  %v81_v9 = vld [vmem:[#allocation2 + $0xe8] sm:$0xff] }
  0x37   :  { %v179_v7 = vadd.f32 %v143_v5, %v142_v4  ;;  %v64_v10 = vld [vmem:[#allocation2 + $0x60] sm:$0xff]  ;;  %v65_v11 = vld [vmem:[#allocation2 + $0x68] sm:$0xff]  ;;  %v126_v12 = vadd.f32 %v81_v9, %v80_v8  ;;  %v82_v20 = vld [vmem:[#allocation2 + $0xf0] sm:$0xff] }
  0x38   :  { %v102_v13 = vadd.f32 %v65_v11, %v64_v10  ;;  %v160_v14 = vld [vmem:[#allocation5 + $0xe0] sm:$0xff]  ;;  %v161_v15 = vld [vmem:[#allocation5 + $0xe8] sm:$0xff]  ;;  %v83_v21 = vld [vmem:[#allocation2 + $0xf8] sm:$0xff] }
  0x39   :  { %115 = vadd.xlane.f32.xlu1 %v114_v28  ;;  %v144_v16 = vld [vmem:[#allocation5 + $0x60] sm:$0xff]  ;;  %v145_v17 = vld [vmem:[#allocation5 + $0x68] sm:$0xff]  ;;  %v206_v18 = vadd.f32 %v161_v15, %v160_v14  ;;  %v66_v22 = vld [vmem:[#allocation2 + $0x70] sm:$0xff]  ;;  %v129_v24 = vadd.f32 %v83_v21, %v82_v20 }
  0x3a   :  { %91 = vadd.xlane.f32.xlu0 %v90_v29  ;;  %v182_v19 = vadd.f32 %v145_v17, %v144_v16  ;;  %v67_v23 = vld [vmem:[#allocation2 + $0x78] sm:$0xff]  ;;  %v162_v26 = vld [vmem:[#allocation5 + $0xf0] sm:$0xff]  ;;  %v425_v32 = vld [vmem:[%s988_s2] sm:$0xff] }
  0x3b   :  { %v105_v25 = vadd.f32 %v67_v23, %v66_v22  ;;  %v163_v27 = vld [vmem:[#allocation5 + $0xf8] sm:$0xff]  ;;  %v146_v28 = vld [vmem:[#allocation5 + $0x70] sm:$0xff]  ;;  %v426_v33 = vld [vmem:[%s988_s2 + $0x8] sm:$0xff] }
  0x3c   :  { %v147_v29 = vld [vmem:[#allocation5 + $0x78] sm:$0xff]  ;;  %v209_v30 = vadd.f32 %v163_v27, %v162_v26  ;;  %v427_v36 = vld [vmem:[%s988_s2 + $0x10] sm:$0xff]  ;;  %v429_v39 = vld [vmem:[%s988_s2 + $0x20] sm:$0xff] }
  0x3d   :  { %195 = vadd.xlane.f32.xlu1 %v194_v34  ;;  %v185_v31 = vadd.f32 %v147_v29, %v146_v28  ;;  %v665_v34 = vpack.c.bf16 %v426_v33, %v425_v32  ;;  %v428_v37 = vld [vmem:[%s988_s2 + $0x18] sm:$0xff]  ;;  %v431_v42 = vld [vmem:[%s988_s2 + $0x30] sm:$0xff] }
  0x3e   :  { %171 = vadd.xlane.f32.xlu0 %v170_v35  ;;  %v761_v35 = vmov 0.0|0.0   ;;  %v668_v38 = vpack.c.bf16 %v428_v37, %v427_v36  ;;  %v432_v43 = vld [vmem:[%s988_s2 + $0x38] sm:$0xff] }
  0x3f   :  { %664 = vmatprep.subr.bf16.mxu0 %v761_v35  ;;  %v674_v44 = vpack.c.bf16 %v432_v43, %v431_v42 }
  0x40   :  { %666 = vmatpush3.bf16.msra.mxu0 %v665_v34 }
  0x41   :  { %118 = vadd.xlane.f32.xlu1 %v117_v40  ;;  %667 = vmatprep.subr.bf16.mxu0 %v761_v35  ;;  %v430_v40 = vld [vmem:[%s988_s2 + $0x28] sm:$0xff] }
  0x42   :  { %94 = vadd.xlane.f32.xlu0 %v93_v41  ;;  %v671_v41 = vpack.c.bf16 %v430_v40, %v429_v39 }
  0x44   :  { %669 = vmatpush3.bf16.msra.mxu0 %v668_v38 }
  0x45   :  { %198 = vadd.xlane.f32.xlu1 %v197_v46  ;;  %670 = vmatprep.subr.bf16.mxu0 %v761_v35 }
  0x46   :  { %174 = vadd.xlane.f32.xlu0 %v173_v47 }
  0x48   :  { %672 = vmatpush3.bf16.msra.mxu0 %v671_v41 }
  0x49   :  { %121 = vadd.xlane.f32.xlu1 %v120_v52  ;;  %673 = vmatprep.subr.bf16.mxu0 %v761_v35 }
  0x4a   :  { %97 = vadd.xlane.f32.xlu0 %v96_v53 }
  0x4c   :  { %675 = vmatpush3.bf16.msra.mxu0 %v674_v44 }
  0x4d   :  { %201 = vadd.xlane.f32.xlu1 %v200_v58 }
  0x4e   :  { %177 = vadd.xlane.f32.xlu0 %v176_v59 }
  0x51   :  { %124 = vadd.xlane.f32.xlu1 %v123_v0  ;;  %v228_v0 = vlaneseq }
  0x52   :  { %100 = vadd.xlane.f32.xlu0 %v99_v1 }
  0x53   :  { %v229_v3 = vand.u32 127, %v228_v0  ;;  %v231_v4 = vshrl.u32 %v228_v0, 7 }
  0x55   :  { %204 = vadd.xlane.f32.xlu1 %v203_v6  ;;  %v234_v5 = vadd.s32 4294967288, %v229_v3  ;;  %v248_v9 = vadd.s32 4294967272, %v229_v3  ;;  %v255_v10 = vadd.s32 4294967264, %v229_v3  ;;  %v232_v11 = vsub.s32 %v229_v3, %v231_v4 }
  0x56   :  { %180 = vadd.xlane.f32.xlu0 %v179_v7  ;;  %v241_v7 = vadd.s32 4294967280, %v229_v3  ;;  %v269_v21 = vadd.s32 4294967248, %v229_v3  ;;  %v276_v22 = vadd.s32 4294967240, %v229_v3 }
  0x57   :  { %v251_v17 = vsub.s32 %v248_v9, %v231_v4 }
  0x58   :  { %v244_v15 = vsub.s32 %v241_v7, %v231_v4  ;;  %v272_v38 = vsub.s32 %v269_v21, %v231_v4  ;;  %v279_v39 = vsub.s32 %v276_v22, %v231_v4 }
  0x59   :  { %127 = vadd.xlane.f32.xlu1 %v126_v12  ;;  %v262_v12 = vadd.s32 4294967256, %v229_v3 }
  0x5a   :  { %103 = vadd.xlane.f32.xlu0 %v102_v13  ;;  %v237_v13 = vsub.s32 %v234_v5, %v231_v4 }
  0x5b   :  { %v900_v20 = vsub.s32 %v262_v12, %v231_v4 }
  0x5d   :  { %207 = vadd.xlane.f32.xlu1 %v206_v18  ;;  %v897_v18 = vsub.s32 %v255_v10, %v231_v4 }
  0x5e   :  { %183 = vadd.xlane.f32.xlu0 %v182_v19 }
  0x61   :  { %130 = vadd.xlane.f32.xlu1 %v129_v24 }
  0x62   :  { %106 = vadd.xlane.f32.xlu0 %v105_v25 }
  0x65   :  { %210 = vadd.xlane.f32.xlu1 %v209_v30 }
  0x66   :  { %186 = vadd.xlane.f32.xlu0 %v185_v31 }
  0xb6   :  { %v849_v46 = vpop.xlane.xlu1 %109 }
  0xb7   :  { %v851_v47 = vpop.xlane.xlu0 %85  ;;  %v286_v19 = vrot.slane %v849_v46, %v232_v11 }
  0xb8   :  { %v233_v33 = vrot.slane %v851_v47, %v232_v11 }
  0xba   :  { %v853_v48 = vpop.xlane.xlu1 %112 }
  0xbb   :  { %v855_v49 = vpop.xlane.xlu0 %88  ;;  %v290_v23 = vrot.slane %v853_v48, %v237_v13 }
  0xbc   :  { %v238_v24 = vrot.slane %v855_v49, %v237_v13 }
  0xbd   :  { %v291_v40 = vsel %vm239_vm1, %v290_v23, %v286_v19 }
  0xbe   :  { %v857_v50 = vpop.xlane.xlu1 %168  ;;  %v240_v41 = vsel %vm239_vm1, %v238_v24, %v233_v33  ;;  %v624_v33 = vld [vmem:[%s989_s3] ss:$0 sm:$0xff]  ;;  %s729_s3 = scalar_lea.vmem %s615_s19, 32 }
  0xbf   :  { %v859_v51 = vpop.xlane.xlu0 %165  ;;  %v348_v25 = vrot.slane %v857_v50, %v237_v13  ;;  %p730_p2 = scmp.ne.s32.totalorder %s615_s19, %s729_s3  ;;  %p735_p4 = scmp.lt.s32.totalorder %s729_s3, %s729_s3 }
  0xc0   :  { %v344_v26 = vrot.slane %v859_v51, %v232_v11 }
  0xc1   :  { %p736_p5 = por %p735_p4, %p734_p3 }
  0xc2   :  { %v861_v52 = vpop.xlane.xlu1 %192  ;;  %v349_v42 = vsel %vm239_vm1, %v348_v25, %v344_v26 }
  0xc3   :  { %v863_v53 = vpop.xlane.xlu0 %189  ;;  %v387_v28 = vrot.slane %v861_v52, %v237_v13  ;;  %p737_p6 = pnand %p736_p5, %p730_p2 }
  0xc4   :  { %v383_v29 = vrot.slane %v863_v53, %v232_v11 }
  0xc6   :  { %v865_v54 = vpop.xlane.xlu1 %115  ;;  %v388_v44 = vsel %vm239_vm1, %v387_v28, %v383_v29 }
  0xc7   :  { %v867_v55 = vpop.xlane.xlu0 %91  ;;  %v295_v30 = vrot.slane %v865_v54, %v244_v15 }
  0xc8   :  { %v245_v31 = vrot.slane %v867_v55, %v244_v15 }
  0xc9   :  { %v296_v45 = vsel %vm246_vm2, %v295_v30, %v291_v40 }
  0xca   :  { %v869_v56 = vpop.xlane.xlu1 %195  ;;  %v247_v46 = vsel %vm246_vm2, %v245_v31, %v240_v41 }
  0xcb   :  { %v871_v57 = vpop.xlane.xlu0 %171  ;;  %v392_v34 = vrot.slane %v869_v56, %v244_v15 }
  0xcc   :  { %v353_v35 = vrot.slane %v871_v57, %v244_v15 }
  0xcd   :  { %v393_v49 = vsel %vm246_vm2, %v392_v34, %v388_v44 }
  0xce   :  { %v873_v58 = vpop.xlane.xlu1 %118  ;;  %v354_v50 = vsel %vm246_vm2, %v353_v35, %v349_v42 }
  0xcf   :  { %v875_v59 = vpop.xlane.xlu0 %94  ;;  %v300_v36 = vrot.slane %v873_v58, %v251_v17 }
  0xd0   :  { %v252_v37 = vrot.slane %v875_v59, %v251_v17 }
  0xd1   :  { %v301_v51 = vsel %vm253_vm3, %v300_v36, %v296_v45 }
  0xd2   :  { %v877_v60 = vpop.xlane.xlu1 %198  ;;  %v254_v53 = vsel %vm253_vm3, %v252_v37, %v247_v46 }
  0xd3   :  { %v879_v61 = vpop.xlane.xlu0 %174  ;;  %v397_v47 = vrot.slane %v877_v60, %v251_v17 }
  0xd4   :  { %v358_v52 = vrot.slane %v879_v61, %v251_v17 }
  0xd6   :  { %v881_v62 = vpop.xlane.xlu1 %121 }
  0xd7   :  { %v883_v63 = vpop.xlane.xlu0 %97  ;;  %v305_v54 = vrot.slane %v881_v62, %v897_v18  ;;  %v398_v62 = vsel %vm253_vm3, %v397_v47, %v393_v49 }
  0xd8   :  { %v259_v55 = vrot.slane %v883_v63, %v897_v18 }
  0xd9   :  { %v306_v7 = vsel %vm260_vm4, %v305_v54, %v301_v51 }
  0xda   :  { %v885_v1 = vpop.xlane.xlu1 %201 }
  0xdb   :  { %v887_v2 = vpop.xlane.xlu0 %177  ;;  %v402_v56 = vrot.slane %v885_v1, %v897_v18 }
  0xdc   :  { %v363_v57 = vrot.slane %v887_v2, %v897_v18  ;;  %v359_v2 = vsel %vm253_vm3, %v358_v52, %v354_v50 }
  0xdd   :  { %v403_v9 = vsel %vm260_vm4, %v402_v56, %v398_v62 }
  0xde   :  { %v889_v6 = vpop.xlane.xlu1 %124  ;;  %v364_v11 = vsel %vm260_vm4, %v363_v57, %v359_v2 }
  0xdf   :  { %v891_v8 = vpop.xlane.xlu0 %100  ;;  %v310_v58 = vrot.slane %v889_v6, %v900_v20 }
  0xe0   :  { %v266_v59 = vrot.slane %v891_v8, %v900_v20  ;;  %v261_v8 = vsel %vm260_vm4, %v259_v55, %v254_v53 }
  0xe1   :  { %v311_v12 = vsel %vm267_vm5, %v310_v58, %v306_v7 }
  0xe2   :  { %v893_v14 = vpop.xlane.xlu1 %204  ;;  %v268_v13 = vsel %vm267_vm5, %v266_v59, %v261_v8 }
  0xe3   :  { %v895_v16 = vpop.xlane.xlu0 %180  ;;  %v407_v60 = vrot.slane %v893_v14, %v900_v20 }
  0xe4   :  { %v368_v63 = vrot.slane %v895_v16, %v900_v20 }
  0xe5   :  { %v408_v14 = vsel %vm267_vm5, %v407_v60, %v403_v9 }
  0xe6   :  { %v128_v27 = vpop.xlane.xlu1 %127  ;;  %v369_v16 = vsel %vm267_vm5, %v368_v63, %v364_v11 }
  0xe7   :  { %v104_v32 = vpop.xlane.xlu0 %103  ;;  %v315_v0 = vrot.slane %v128_v27, %v272_v38 }
  0xe8   :  { %v273_v1 = vrot.slane %v104_v32, %v272_v38  ;;  %v515_v32 = vld [vmem:[%s990_s4] sm:$0xf]  ;;  %s764_s4 = smov 64  }
  0xe9   :  { %v316_v17 = vsel %vm274_vm6, %v315_v0, %v311_v12  ;;  %660 = vmatpush3.msk.msra.mxu1 %vm527_vm12, %v515_v32 }
  0xea   :  { %v208_v43 = vpop.xlane.xlu1 %207  ;;  %v275_v18 = vsel %vm274_vm6, %v273_v1, %v268_v13 }
  0xeb   :  { %v184_v48 = vpop.xlane.xlu0 %183  ;;  %v412_v4 = vrot.slane %v208_v43, %v272_v38 }
  0xec   :  { %v373_v10 = vrot.slane %v184_v48, %v272_v38  ;;  %v626_v38 = vld [vmem:[%s991_s5] ss:$0 sm:$0xff] }
  0xed   :  { %v413_v21 = vsel %vm274_vm6, %v412_v4, %v408_v14 }
  0xee   :  { %v131_v61 = vpop.xlane.xlu1 %130  ;;  %v374_v25 = vsel %vm274_vm6, %v373_v10, %v369_v16 }
  0xef   :  { %v107_v3 = vpop.xlane.xlu0 %106  ;;  %v320_v5 = vrot.slane %v131_v61, %v279_v39 }
  0xf0   :  { %v280_v6 = vrot.slane %v107_v3, %v279_v39 }
  0xf1   :  { %v321_v22 = vsel %vm281_vm7, %v320_v5, %v316_v17 }
  0xf2   :  { %v211_v15 = vpop.xlane.xlu1 %210  ;;  %v282_v23 = vsel %vm281_vm7, %v280_v6, %v275_v18 }
  0xf3   :  { %v417_v19 = vrot.slane %v211_v15, %v279_v39  ;;  %v187_v20 = vpop.xlane.xlu0 %186  ;;  %v323_v28 = vsel %vm322_vm8, %v321_v22, %v282_v23 }
  0xf4   :  { %v378_v24 = vrot.slane %v187_v20, %v279_v39 }
  0xf5   :  { %v418_v26 = vsel %vm281_vm7, %v417_v19, %v413_v21 }
  0xf6   :  { %v379_v27 = vsel %vm281_vm7, %v378_v24, %v374_v25 }
  0xf7   :  { %v420_v29 = vsel %vm419_vm9, %v418_v26, %v379_v27 }
  0xf8   :  { %v423_v30 = vsel %vm422_vm10, %v323_v28, %v420_v29 }
  0xf9   :  { %v424_v31 = vmul.f32 0.00390625, %v423_v30 }
  0xfb   :  { %657 = vmatmul.mubr.msk.f32.vlgmr.msra.gmra.mrb[0].mxu0 %vm440_vm11, %v424_v31 }
 0x1ce   :  { %v510_v34 = vpop.f32.mrb[0].mxu0 }
 0x1cf   :  { %v511_v35 = vadd.f32 %v624_v33, %v510_v34  ;;  %v658_v36 = vpop.f32.mrb[1].mxu0 }
 0x1d1   :  { %v514_v37 = vmax.f32 %v511_v35, 0.0 }
 0x1d3   :  { %662 = vmatmul.mubr.msk.f32.vlgmr.msra.gmra.mrb[0].mxu1 %vm523_vm13, %v514_v37 }
 0x2a6   :  { %v597_v39 = vpop.f32.mrb[0].mxu1 }
 0x2a7   :  { %v598_v40 = vadd.f32 %v626_v38, %v597_v39  ;;  %v663_v41 = vpop.f32.mrb[1].mxu1 }
 0x2a9   :  { %v602_v42 = vrot.slane %v598_v40, 2 }
 0x2ab   :  { %603 = vrot.lane.b32.xlu0 %v602_v42, %s764_s4 }
 0x31d   :  { %v604_v43 = vpop.permute.xlu0 %603 }
 0x31e   :  { %v606_v44 = vsel %vm440_vm11, %v598_v40, %v604_v43 }
 0x31f   :  { %607 = vst [vmem:[#allocation7] sm:$0x3] %v606_v44 }
 0x320   :  { %740 = shalt.err (!%p737_p6)
}
 0x321   :  { %s741_s0 = scalar_lea.hbm %s992_s6, 32 }
 0x322   :  { %p742_p7 = scmp.ne.s32.totalorder %s992_s6, %s741_s0  ;;  %p745_p8 = scmp.lt.u32.totalorder %s741_s0, %s992_s6 }
 0x324   :  { %p747_p9 = pnand %p745_p8, %p742_p7 }
 0x326   :  { %750 = shalt.err (!%p747_p9)
}
 0x327   :  { %617 = dma.vmem_to_hbm [thread:$0]  %s615_s19, 32, %s992_s6, [#allocation4]  }
 0x328   :  { %755 = dma.done.wait [#allocation4], 32  }
 0x329   :  { %756 = vsyncadd [#allocation4], 4294967264 }
 0x32a   :  { %621 = vsyncpa [#allocation3], 1 }
 0x32b   :  { %622 = vsyncpa [#allocation6], 1 }
 0x32c   :  { %623 = vsyncpa [#allocation4], 1 }

</bundles_post_ra>
